<compile_context>
chip_gen: v7x
topology: tpu7x:2x2x1
jax: 0.10.0
libtpu: 0.0.40
codegen_flags: <defaults>
</compile_context>

<pallas_src>
import jax
import jax.numpy as jnp
from jax.experimental import pallas as pl
from jax.experimental.pallas import tpu as pltpu


def _round_up(x, m):
    return ((x + m - 1) // m) * m


# ----------------------------------------------------------------------------
# Pallas kernel: 4x (MXU matmul + bias + ReLU).  Weights resident in VMEM.
# Input arrives as f32 (bandwidth-optimal: no wrapper-side cast pass) and is
# cast to bf16 in-register; all matmuls accumulate in f32.
# ----------------------------------------------------------------------------
def _mlp_kernel(x_ref, w1_ref, b1_ref, w2_ref, b2_ref,
                w3_ref, b3_ref, w4_ref, b4_ref, o_ref):
    x = x_ref[...].astype(jnp.bfloat16)                                # (TB, D_in)

    h = jnp.dot(x, w1_ref[...], preferred_element_type=jnp.float32)   # (TB, 128)
    h = jnp.maximum(h + b1_ref[...], 0.0)

    h = jnp.dot(h.astype(jnp.bfloat16), w2_ref[...],
                preferred_element_type=jnp.float32)                   # (TB, 128)
    h = jnp.maximum(h + b2_ref[...], 0.0)

    h = jnp.dot(h.astype(jnp.bfloat16), w3_ref[...],
                preferred_element_type=jnp.float32)                   # (TB, 128)
    h = jnp.maximum(h + b3_ref[...], 0.0)

    h = jnp.dot(h.astype(jnp.bfloat16), w4_ref[...],
                preferred_element_type=jnp.float32)                   # (TB, 256)
    h = jnp.maximum(h + b4_ref[...], 0.0)

    o_ref[...] = h.astype(o_ref.dtype)


# ----------------------------------------------------------------------------
# Parameter preprocessing: bf16 weights, f32 biases, layer-1 width padded
# 64 -> 128 so every matmul N/K dim is a multiple of 128 (lane-dense).
# ReLU(0+0)=0 feeds zero rows of W2, so results are unchanged.
# ----------------------------------------------------------------------------
def _prep_params(params):
    w1, b1, w2, b2, w3, b3, w4, b4 = params
    h1 = w1.shape[1]
    h1p = _round_up(h1, 128)
    if h1p != h1:
        w1 = jnp.pad(w1, ((0, 0), (0, h1p - h1)))
        b1 = jnp.pad(b1, ((0, 0), (0, h1p - h1)))
        w2 = jnp.pad(w2, ((0, h1p - h1), (0, 0)))
    bf16 = lambda a: a.astype(jnp.bfloat16)
    f32 = lambda a: a.astype(jnp.float32)
    return (bf16(w1), f32(b1), bf16(w2), f32(b2),
            bf16(w3), f32(b3), bf16(w4), f32(b4))


# ----------------------------------------------------------------------------
# Hardware queries (defensive: fall back to conservative values).
# ----------------------------------------------------------------------------
def _vmem_capacity_bytes():
    try:
        return int(pltpu.get_tpu_info().vmem_capacity_bytes)
    except Exception:
        return 64 << 20  # v7x per-TC VMEM (smallest modern generation)


def _num_tensorcores():
    try:
        info = pltpu.get_tpu_info()
    except Exception:
        return 1
    for name in ("num_cores", "tensorcore_count", "num_tensorcores",
                 "cores_per_chip", "num_tensor_cores"):
        v = getattr(info, name, None)
        if isinstance(v, int) and v > 0:
            return v
    return 1


def contrastive_model_forward(x, params, *, batch_tile=4096,
                              out_dtype=jnp.float32):
    """x: (B, H, W) float32.  Returns (B, 256) in `out_dtype` (default f32).

    Pass out_dtype=jnp.bfloat16 if downstream tolerates it: the output is the
    single largest HBM stream of this bandwidth-bound kernel.
    """
    B = x.shape[0]
    d_in = x.shape[1] * x.shape[2]
    x2d = x.reshape(B, d_in)                     # nn.Flatten(); f32 streamed as-is

    w1, b1, w2, b2, w3, b3, w4, b4 = _prep_params(params)
    weights = (w1, b1, w2, b2, w3, b3, w4, b4)
    d_out = w4.shape[1]
    out_itemsize = jnp.dtype(out_dtype).itemsize

    weight_bytes = sum(int(a.size) * a.dtype.itemsize for a in weights)

    def vmem_need(bt):
        # double-buffered input + output tiles, (up to) double-buffered weights,
        # plus internal scratch headroom.
        return (2 * bt * d_in * 4 + 2 * bt * d_out * out_itemsize
                + 2 * weight_bytes + (2 << 20))

    # ---- batch tile selection ------------------------------------------------
    vmem_cap = _vmem_capacity_bytes()
    vmem_budget = int(vmem_cap * 0.70)

    bt = min(_round_up(batch_tile, 8), _round_up(B, 8))
    while vmem_need(bt) > vmem_budget and bt > 8:
        bt = max(8, _round_up(bt // 2, 8))

    # Multi-TensorCore chips only (v7x): give every core >= 2 grid steps and an
    # even split (multiple of core count).  Single-TC chips keep the biggest
    # tile — splitting there only adds ~0.35 us/step overhead.
    num_cores = _num_tensorcores()
    if num_cores > 1 and B > 8 * num_cores:
        steps = pl.cdiv(B, bt)
        target = _round_up(max(steps, 2 * num_cores), num_cores)
        if target != steps:
            bt = max(8, _round_up(pl.cdiv(B, target), 8))

    grid = (pl.cdiv(B, bt),)
    vmem_limit = int(min(vmem_cap, max(32 << 20, vmem_need(bt) + (4 << 20))))

    # ---- cost estimate (f32 input stream, out_dtype output stream) ----------
    flops = 2 * B * (d_in * w1.shape[1] + w2.shape[0] * w2.shape[1]
                     + w3.shape[0] * w3.shape[1] + w4.shape[0] * w4.shape[1])
    bytes_accessed = (B * d_in * 4 + B * d_out * out_itemsize + weight_bytes)
    cost = pl.CostEstimate(flops=flops, transcendentals=0,
                           bytes_accessed=bytes_accessed)

    # ---- specs ----------------------------------------------------------------
    def _const_spec(shape, single_buffer):
        idx = (lambda n: (lambda i: (0,) * n))(len(shape))
        if single_buffer:
            # Grid-constant block: the second pipeline buffer is dead VMEM.
            return pl.BlockSpec(shape, idx, pipeline_mode=pl.Buffered(1))
        return pl.BlockSpec(shape, idx)

    def _run(single_buffer_weights):
        in_specs = [pl.BlockSpec((bt, d_in), lambda i: (i, 0))]
        in_specs += [_const_spec(a.shape, single_buffer_weights) for a in weights]
        return pl.pallas_call(
            _mlp_kernel,
            out_shape=jax.ShapeDtypeStruct((B, d_out), out_dtype),
            grid_spec=pltpu.PrefetchScalarGridSpec(
                num_scalar_prefetch=0,
                grid=grid,
                in_specs=in_specs,
                out_specs=pl.BlockSpec((bt, d_out), lambda i: (i, 0)),
            ),
            compiler_params=pltpu.CompilerParams(
                dimension_semantics=("parallel",),
                vmem_limit_bytes=vmem_limit),
            cost_estimate=cost,
        )(x2d, *weights)

    if hasattr(pl, "Buffered"):
        try:
            return _run(True)
        except Exception:
            # pipeline_mode=pl.Buffered(1) not supported by this jax build;
            # fall back to default (double) buffering for the constant blocks.
            pass
    return _run(False)


# ----------------------------------------------------------------------------
# Deterministic parameter initialization (PyTorch-style uniform(-1/sqrt(in))).
# ----------------------------------------------------------------------------
def init_params(key, d_in):
    dims = [(d_in, 64), (64, 128), (128, 128), (128, 256)]
    params = []
    for (fan_in, fan_out) in dims:
        key, kw, kb = jax.random.split(key, 3)
        bound = 1.0 / jnp.sqrt(float(fan_in))
        w = jax.random.uniform(kw, (fan_in, fan_out), jnp.float32,
                               minval=-bound, maxval=bound)
        b = jax.random.uniform(kb, (1, fan_out), jnp.float32,
                               minval=-bound, maxval=bound)
        params.extend([w, b])
    return tuple(params)


if __name__ == "__main__":
    # Module-consistent small shapes: input (B, H, W) = (2, 16, 16), so the
    # first Linear has 16*16 = 256 input features.
    B, H, W = 2, 16, 16
    key = jax.random.PRNGKey(0)
    kx, kp = jax.random.split(key)

    x = jax.random.normal(kx, (B, H, W), jnp.float32)
    params = init_params(kp, H * W)

    y = contrastive_model_forward(x, params)
    y = jax.block_until_ready(y)
    assert y.shape == (B, 256), y.shape
    assert y.dtype == jnp.float32, y.dtype

    # Reference matching the kernel's mixed precision (bf16 casts, f32 accum).
    def ref_mixed(x2d, p):
        w1, b1, w2, b2, w3, b3, w4, b4 = p
        h = x2d.astype(jnp.bfloat16)
        for w, b in ((w1, b1), (w2, b2), (w3, b3), (w4, b4)):
            h = jnp.dot(h, w.astype(jnp.bfloat16),
                        preferred_element_type=jnp.float32)
            h = jnp.maximum(h + b, 0.0).astype(jnp.bfloat16)
        return h.astype(jnp.float32)

    # Pure-f32 reference of the original PyTorch module semantics.
    def ref_f32(x2d, p):
        w1, b1, w2, b2, w3, b3, w4, b4 = p
        h = x2d
        for w, b in ((w1, b1), (w2, b2), (w3, b3), (w4, b4)):
            h = jnp.maximum(h @ w + b, 0.0)
        return h

    x2d = x.reshape(B, H * W)
    y_mixed = ref_mixed(x2d, params)
    y_f32 = ref_f32(x2d, params)

    assert jnp.allclose(y, y_mixed, atol=1e-2, rtol=1e-2), \
        float(jnp.max(jnp.abs(y - y_mixed)))
    assert jnp.allclose(y, y_f32, atol=0.1, rtol=0.1), \
        float(jnp.max(jnp.abs(y - y_f32)))

    print("KERNEL_OK")
</pallas_src>

<mosaic_0001>
module attributes {stable_mosaic.version = 11 : i64} {
  func.func @_mlp_kernel(%arg0: i32, %arg1: memref<8x256xf32, #tpu.memory_space<vmem>>, %arg2: memref<256x128xbf16, #tpu.memory_space<vmem>>, %arg3: memref<1x128xf32, #tpu.memory_space<vmem>>, %arg4: memref<128x128xbf16, #tpu.memory_space<vmem>>, %arg5: memref<1x128xf32, #tpu.memory_space<vmem>>, %arg6: memref<128x128xbf16, #tpu.memory_space<vmem>>, %arg7: memref<1x128xf32, #tpu.memory_space<vmem>>, %arg8: memref<128x256xbf16, #tpu.memory_space<vmem>>, %arg9: memref<1x256xf32, #tpu.memory_space<vmem>>, %arg10: memref<8x256xf32, #tpu.memory_space<vmem>>) attributes {dimension_semantics = [#tpu.dimension_semantics<parallel>], iteration_bounds = array<i64: 1>, scalar_prefetch = 0 : i64, scratch_operands = 0 : i64, tpu.core_type = #tpu.core_type<tc>, window_params = [{transform_indices = @transform_0, window_bounds = array<i64: 8, 256>}, {pipeline_mode = #tpu.pipeline_mode<synchronous>, transform_indices = @transform_1, window_bounds = array<i64: 256, 128>}, {pipeline_mode = #tpu.pipeline_mode<synchronous>, transform_indices = @transform_2, window_bounds = array<i64: 1, 128>}, {pipeline_mode = #tpu.pipeline_mode<synchronous>, transform_indices = @transform_3, window_bounds = array<i64: 128, 128>}, {pipeline_mode = #tpu.pipeline_mode<synchronous>, transform_indices = @transform_4, window_bounds = array<i64: 1, 128>}, {pipeline_mode = #tpu.pipeline_mode<synchronous>, transform_indices = @transform_5, window_bounds = array<i64: 128, 128>}, {pipeline_mode = #tpu.pipeline_mode<synchronous>, transform_indices = @transform_6, window_bounds = array<i64: 1, 128>}, {pipeline_mode = #tpu.pipeline_mode<synchronous>, transform_indices = @transform_7, window_bounds = array<i64: 128, 256>}, {pipeline_mode = #tpu.pipeline_mode<synchronous>, transform_indices = @transform_8, window_bounds = array<i64: 1, 256>}, {transform_indices = @transform_9, window_bounds = array<i64: 8, 256>}]} {
    %c0 = arith.constant 0 : index
    %c0_0 = arith.constant 0 : index
    %0 = vector.load %arg1[%c0, %c0_0] : memref<8x256xf32, #tpu.memory_space<vmem>>, vector<8x256xf32>
    %1 = arith.truncf %0 : vector<8x256xf32> to vector<8x256xbf16>
    %c0_1 = arith.constant 0 : index
    %c0_2 = arith.constant 0 : index
    %2 = vector.load %arg2[%c0_1, %c0_2] : memref<256x128xbf16, #tpu.memory_space<vmem>>, vector<256x128xbf16>
    %cst = arith.constant dense<0.000000e+00> : vector<8x128xf32>
    %3 = tpu.matmul %1, %2, %cst {dimension_numbers = #tpu.dot_dimension_numbers<[1], [0], [0], [1], [0, 0, 1, 1], [], []>} : vector<8x256xbf16>, vector<256x128xbf16>, vector<8x128xf32> -> vector<8x128xf32>
    %c0_3 = arith.constant 0 : index
    %c0_4 = arith.constant 0 : index
    %4 = vector.load %arg3[%c0_3, %c0_4] : memref<1x128xf32, #tpu.memory_space<vmem>>, vector<1x128xf32>
    %5 = vector.broadcast %4 : vector<1x128xf32> to vector<8x128xf32>
    %6 = arith.addf %3, %5 : vector<8x128xf32>
    %cst_5 = arith.constant 0.000000e+00 : f32
    %7 = vector.broadcast %cst_5 : f32 to vector<8x128xf32>
    %8 = arith.maximumf %6, %7 : vector<8x128xf32>
    %9 = arith.truncf %8 : vector<8x128xf32> to vector<8x128xbf16>
    %c0_6 = arith.constant 0 : index
    %c0_7 = arith.constant 0 : index
    %10 = vector.load %arg4[%c0_6, %c0_7] : memref<128x128xbf16, #tpu.memory_space<vmem>>, vector<128x128xbf16>
    %cst_8 = arith.constant dense<0.000000e+00> : vector<8x128xf32>
    %11 = tpu.matmul %9, %10, %cst_8 {dimension_numbers = #tpu.dot_dimension_numbers<[1], [0], [0], [1], [0, 0, 1, 1], [], []>} : vector<8x128xbf16>, vector<128x128xbf16>, vector<8x128xf32> -> vector<8x128xf32>
    %c0_9 = arith.constant 0 : index
    %c0_10 = arith.constant 0 : index
    %12 = vector.load %arg5[%c0_9, %c0_10] : memref<1x128xf32, #tpu.memory_space<vmem>>, vector<1x128xf32>
    %13 = vector.broadcast %12 : vector<1x128xf32> to vector<8x128xf32>
    %14 = arith.addf %11, %13 : vector<8x128xf32>
    %cst_11 = arith.constant 0.000000e+00 : f32
    %15 = vector.broadcast %cst_11 : f32 to vector<8x128xf32>
    %16 = arith.maximumf %14, %15 : vector<8x128xf32>
    %17 = arith.truncf %16 : vector<8x128xf32> to vector<8x128xbf16>
    %c0_12 = arith.constant 0 : index
    %c0_13 = arith.constant 0 : index
    %18 = vector.load %arg6[%c0_12, %c0_13] : memref<128x128xbf16, #tpu.memory_space<vmem>>, vector<128x128xbf16>
    %cst_14 = arith.constant dense<0.000000e+00> : vector<8x128xf32>
    %19 = tpu.matmul %17, %18, %cst_14 {dimension_numbers = #tpu.dot_dimension_numbers<[1], [0], [0], [1], [0, 0, 1, 1], [], []>} : vector<8x128xbf16>, vector<128x128xbf16>, vector<8x128xf32> -> vector<8x128xf32>
    %c0_15 = arith.constant 0 : index
    %c0_16 = arith.constant 0 : index
    %20 = vector.load %arg7[%c0_15, %c0_16] : memref<1x128xf32, #tpu.memory_space<vmem>>, vector<1x128xf32>
    %21 = vector.broadcast %20 : vector<1x128xf32> to vector<8x128xf32>
    %22 = arith.addf %19, %21 : vector<8x128xf32>
    %cst_17 = arith.constant 0.000000e+00 : f32
    %23 = vector.broadcast %cst_17 : f32 to vector<8x128xf32>
    %24 = arith.maximumf %22, %23 : vector<8x128xf32>
    %25 = arith.truncf %24 : vector<8x128xf32> to vector<8x128xbf16>
    %c0_18 = arith.constant 0 : index
    %c0_19 = arith.constant 0 : index
    %26 = vector.load %arg8[%c0_18, %c0_19] : memref<128x256xbf16, #tpu.memory_space<vmem>>, vector<128x256xbf16>
    %cst_20 = arith.constant dense<0.000000e+00> : vector<8x256xf32>
    %27 = tpu.matmul %25, %26, %cst_20 {dimension_numbers = #tpu.dot_dimension_numbers<[1], [0], [0], [1], [0, 0, 1, 1], [], []>} : vector<8x128xbf16>, vector<128x256xbf16>, vector<8x256xf32> -> vector<8x256xf32>
    %c0_21 = arith.constant 0 : index
    %c0_22 = arith.constant 0 : index
    %28 = vector.load %arg9[%c0_21, %c0_22] : memref<1x256xf32, #tpu.memory_space<vmem>>, vector<1x256xf32>
    %29 = vector.broadcast %28 : vector<1x256xf32> to vector<8x256xf32>
    %30 = arith.addf %27, %29 : vector<8x256xf32>
    %cst_23 = arith.constant 0.000000e+00 : f32
    %31 = vector.broadcast %cst_23 : f32 to vector<8x256xf32>
    %32 = arith.maximumf %30, %31 : vector<8x256xf32>
    %c0_24 = arith.constant 0 : index
    %c0_25 = arith.constant 0 : index
    %33 = vector.load %arg10[%c0_24, %c0_25] : memref<8x256xf32, #tpu.memory_space<vmem>>, vector<8x256xf32>
    tpu.vector_store %arg10[%c0_24, %c0_25], %32 {strides = array<i32>} : memref<8x256xf32, #tpu.memory_space<vmem>>, vector<8x256xf32>,
    return
  }
  func.func @transform_0(%arg0: i32) -> (i32, i32) {
    %c0_i32 = arith.constant 0 : i32
    %c0_i32_0 = arith.constant 0 : i32
    return %arg0, %c0_i32 : i32, i32
  }
  func.func @transform_1(%arg0: i32) -> (i32, i32) {
    %c0_i32 = arith.constant 0 : i32
    %c0_i32_0 = arith.constant 0 : i32
    %c0_i32_1 = arith.constant 0 : i32
    return %c0_i32, %c0_i32_0 : i32, i32
  }
  func.func @transform_2(%arg0: i32) -> (i32, i32) {
    %c0_i32 = arith.constant 0 : i32
    %c0_i32_0 = arith.constant 0 : i32
    %c0_i32_1 = arith.constant 0 : i32
    return %c0_i32, %c0_i32_0 : i32, i32
  }
  func.func @transform_3(%arg0: i32) -> (i32, i32) {
    %c0_i32 = arith.constant 0 : i32
    %c0_i32_0 = arith.constant 0 : i32
    %c0_i32_1 = arith.constant 0 : i32
    return %c0_i32, %c0_i32_0 : i32, i32
  }
  func.func @transform_4(%arg0: i32) -> (i32, i32) {
    %c0_i32 = arith.constant 0 : i32
    %c0_i32_0 = arith.constant 0 : i32
    %c0_i32_1 = arith.constant 0 : i32
    return %c0_i32, %c0_i32_0 : i32, i32
  }
  func.func @transform_5(%arg0: i32) -> (i32, i32) {
    %c0_i32 = arith.constant 0 : i32
    %c0_i32_0 = arith.constant 0 : i32
    %c0_i32_1 = arith.constant 0 : i32
    return %c0_i32, %c0_i32_0 : i32, i32
  }
  func.func @transform_6(%arg0: i32) -> (i32, i32) {
    %c0_i32 = arith.constant 0 : i32
    %c0_i32_0 = arith.constant 0 : i32
    %c0_i32_1 = arith.constant 0 : i32
    return %c0_i32, %c0_i32_0 : i32, i32
  }
  func.func @transform_7(%arg0: i32) -> (i32, i32) {
    %c0_i32 = arith.constant 0 : i32
    %c0_i32_0 = arith.constant 0 : i32
    %c0_i32_1 = arith.constant 0 : i32
    return %c0_i32, %c0_i32_0 : i32, i32
  }
  func.func @transform_8(%arg0: i32) -> (i32, i32) {
    %c0_i32 = arith.constant 0 : i32
    %c0_i32_0 = arith.constant 0 : i32
    %c0_i32_1 = arith.constant 0 : i32
    return %c0_i32, %c0_i32_0 : i32, i32
  }
  func.func @transform_9(%arg0: i32) -> (i32, i32) {
    %c0_i32 = arith.constant 0 : i32
    %c0_i32_0 = arith.constant 0 : i32
    return %arg0, %c0_i32 : i32, i32
  }
}

module attributes {stable_mosaic.version = 11 : i64} {
  func.func @_mlp_kernel(%arg0: i32, %arg1: memref<8x256xf32, #tpu.memory_space<vmem>>, %arg2: memref<256x128xbf16, #tpu.memory_space<vmem>>, %arg3: memref<1x128xf32, #tpu.memory_space<vmem>>, %arg4: memref<128x128xbf16, #tpu.memory_space<vmem>>, %arg5: memref<1x128xf32, #tpu.memory_space<vmem>>, %arg6: memref<128x128xbf16, #tpu.memory_space<vmem>>, %arg7: memref<1x128xf32, #tpu.memory_space<vmem>>, %arg8: memref<128x256xbf16, #tpu.memory_space<vmem>>, %arg9: memref<1x256xf32, #tpu.memory_space<vmem>>, %arg10: memref<8x256xf32, #tpu.memory_space<vmem>>) attributes {dimension_semantics = [#tpu.dimension_semantics<parallel>], iteration_bounds = array<i64: 1>, scalar_prefetch = 0 : i64, scratch_operands = 0 : i64, tpu.core_type = #tpu.core_type<tc>, window_params = [{transform_indices = @transform_0, window_bounds = array<i64: 8, 256>}, {pipeline_mode = #tpu.pipeline_mode<synchronous>, transform_indices = @transform_1, window_bounds = array<i64: 256, 128>}, {pipeline_mode = #tpu.pipeline_mode<synchronous>, transform_indices = @transform_2, window_bounds = array<i64: 1, 128>}, {pipeline_mode = #tpu.pipeline_mode<synchronous>, transform_indices = @transform_3, window_bounds = array<i64: 128, 128>}, {pipeline_mode = #tpu.pipeline_mode<synchronous>, transform_indices = @transform_4, window_bounds = array<i64: 1, 128>}, {pipeline_mode = #tpu.pipeline_mode<synchronous>, transform_indices = @transform_5, window_bounds = array<i64: 128, 128>}, {pipeline_mode = #tpu.pipeline_mode<synchronous>, transform_indices = @transform_6, window_bounds = array<i64: 1, 128>}, {pipeline_mode = #tpu.pipeline_mode<synchronous>, transform_indices = @transform_7, window_bounds = array<i64: 128, 256>}, {pipeline_mode = #tpu.pipeline_mode<synchronous>, transform_indices = @transform_8, window_bounds = array<i64: 1, 256>}, {transform_indices = @transform_9, window_bounds = array<i64: 8, 256>}]} {
    %c0 = arith.constant 0 : index
    %c0_0 = arith.constant 0 : index
    %0 = vector.load %arg1[%c0, %c0_0] : memref<8x256xf32, #tpu.memory_space<vmem>>, vector<8x256xf32>
    %1 = arith.truncf %0 : vector<8x256xf32> to vector<8x256xbf16>
    %c0_1 = arith.constant 0 : index
    %c0_2 = arith.constant 0 : index
    %2 = vector.load %arg2[%c0_1, %c0_2] : memref<256x128xbf16, #tpu.memory_space<vmem>>, vector<256x128xbf16>
    %cst = arith.constant dense<0.000000e+00> : vector<8x128xf32>
    %3 = tpu.matmul %1, %2, %cst {dimension_numbers = #tpu.dot_dimension_numbers<[1], [0], [0], [1], [0, 0, 1, 1], [], []>} : vector<8x256xbf16>, vector<256x128xbf16>, vector<8x128xf32> -> vector<8x128xf32>
    %c0_3 = arith.constant 0 : index
    %c0_4 = arith.constant 0 : index
    %4 = vector.load %arg3[%c0_3, %c0_4] : memref<1x128xf32, #tpu.memory_space<vmem>>, vector<1x128xf32>
    %5 = vector.broadcast %4 : vector<1x128xf32> to vector<8x128xf32>
    %6 = arith.addf %3, %5 : vector<8x128xf32>
    %cst_5 = arith.constant 0.000000e+00 : f32
    %7 = vector.broadcast %cst_5 : f32 to vector<8x128xf32>
    %8 = arith.maximumf %6, %7 : vector<8x128xf32>
    %9 = arith.truncf %8 : vector<8x128xf32> to vector<8x128xbf16>
    %c0_6 = arith.constant 0 : index
    %c0_7 = arith.constant 0 : index
    %10 = vector.load %arg4[%c0_6, %c0_7] : memref<128x128xbf16, #tpu.memory_space<vmem>>, vector<128x128xbf16>
    %cst_8 = arith.constant dense<0.000000e+00> : vector<8x128xf32>
    %11 = tpu.matmul %9, %10, %cst_8 {dimension_numbers = #tpu.dot_dimension_numbers<[1], [0], [0], [1], [0, 0, 1, 1], [], []>} : vector<8x128xbf16>, vector<128x128xbf16>, vector<8x128xf32> -> vector<8x128xf32>
    %c0_9 = arith.constant 0 : index
    %c0_10 = arith.constant 0 : index
    %12 = vector.load %arg5[%c0_9, %c0_10] : memref<1x128xf32, #tpu.memory_space<vmem>>, vector<1x128xf32>
    %13 = vector.broadcast %12 : vector<1x128xf32> to vector<8x128xf32>
    %14 = arith.addf %11, %13 : vector<8x128xf32>
    %cst_11 = arith.constant 0.000000e+00 : f32
    %15 = vector.broadcast %cst_11 : f32 to vector<8x128xf32>
    %16 = arith.maximumf %14, %15 : vector<8x128xf32>
    %17 = arith.truncf %16 : vector<8x128xf32> to vector<8x128xbf16>
    %c0_12 = arith.constant 0 : index
    %c0_13 = arith.constant 0 : index
    %18 = vector.load %arg6[%c0_12, %c0_13] : memref<128x128xbf16, #tpu.memory_space<vmem>>, vector<128x128xbf16>
    %cst_14 = arith.constant dense<0.000000e+00> : vector<8x128xf32>
    %19 = tpu.matmul %17, %18, %cst_14 {dimension_numbers = #tpu.dot_dimension_numbers<[1], [0], [0], [1], [0, 0, 1, 1], [], []>} : vector<8x128xbf16>, vector<128x128xbf16>, vector<8x128xf32> -> vector<8x128xf32>
    %c0_15 = arith.constant 0 : index
    %c0_16 = arith.constant 0 : index
    %20 = vector.load %arg7[%c0_15, %c0_16] : memref<1x128xf32, #tpu.memory_space<vmem>>, vector<1x128xf32>
    %21 = vector.broadcast %20 : vector<1x128xf32> to vector<8x128xf32>
    %22 = arith.addf %19, %21 : vector<8x128xf32>
    %cst_17 = arith.constant 0.000000e+00 : f32
    %23 = vector.broadcast %cst_17 : f32 to vector<8x128xf32>
    %24 = arith.maximumf %22, %23 : vector<8x128xf32>
    %25 = arith.truncf %24 : vector<8x128xf32> to vector<8x128xbf16>
    %c0_18 = arith.constant 0 : index
    %c0_19 = arith.constant 0 : index
    %26 = vector.load %arg8[%c0_18, %c0_19] : memref<128x256xbf16, #tpu.memory_space<vmem>>, vector<128x256xbf16>
    %cst_20 = arith.constant dense<0.000000e+00> : vector<8x256xf32>
    %27 = tpu.matmul %25, %26, %cst_20 {dimension_numbers = #tpu.dot_dimension_numbers<[1], [0], [0], [1], [0, 0, 1, 1], [], []>} : vector<8x128xbf16>, vector<128x256xbf16>, vector<8x256xf32> -> vector<8x256xf32>
    %c0_21 = arith.constant 0 : index
    %c0_22 = arith.constant 0 : index
    %28 = vector.load %arg9[%c0_21, %c0_22] : memref<1x256xf32, #tpu.memory_space<vmem>>, vector<1x256xf32>
    %29 = vector.broadcast %28 : vector<1x256xf32> to vector<8x256xf32>
    %30 = arith.addf %27, %29 : vector<8x256xf32>
    %cst_23 = arith.constant 0.000000e+00 : f32
    %31 = vector.broadcast %cst_23 : f32 to vector<8x256xf32>
    %32 = arith.maximumf %30, %31 : vector<8x256xf32>
    %c0_24 = arith.constant 0 : index
    %c0_25 = arith.constant 0 : index
    %33 = vector.load %arg10[%c0_24, %c0_25] : memref<8x256xf32, #tpu.memory_space<vmem>>, vector<8x256xf32>
    tpu.vector_store %arg10[%c0_24, %c0_25], %32 {strides = array<i32>} : memref<8x256xf32, #tpu.memory_space<vmem>>, vector<8x256xf32>,
    return
  }
  func.func @transform_0(%arg0: i32) -> (i32, i32) {
    %c0_i32 = arith.constant 0 : i32
    %c0_i32_0 = arith.constant 0 : i32
    return %arg0, %c0_i32 : i32, i32
  }
  func.func @transform_1(%arg0: i32) -> (i32, i32) {
    %c0_i32 = arith.constant 0 : i32
    %c0_i32_0 = arith.constant 0 : i32
    %c0_i32_1 = arith.constant 0 : i32
    return %c0_i32, %c0_i32_0 : i32, i32
  }
  func.func @transform_2(%arg0: i32) -> (i32, i32) {
    %c0_i32 = arith.constant 0 : i32
    %c0_i32_0 = arith.constant 0 : i32
    %c0_i32_1 = arith.constant 0 : i32
    return %c0_i32, %c0_i32_0 : i32, i32
  }
  func.func @transform_3(%arg0: i32) -> (i32, i32) {
    %c0_i32 = arith.constant 0 : i32
    %c0_i32_0 = arith.constant 0 : i32
    %c0_i32_1 = arith.constant 0 : i32
    return %c0_i32, %c0_i32_0 : i32, i32
  }
  func.func @transform_4(%arg0: i32) -> (i32, i32) {
    %c0_i32 = arith.constant 0 : i32
    %c0_i32_0 = arith.constant 0 : i32
    %c0_i32_1 = arith.constant 0 : i32
    return %c0_i32, %c0_i32_0 : i32, i32
  }
  func.func @transform_5(%arg0: i32) -> (i32, i32) {
    %c0_i32 = arith.constant 0 : i32
    %c0_i32_0 = arith.constant 0 : i32
    %c0_i32_1 = arith.constant 0 : i32
    return %c0_i32, %c0_i32_0 : i32, i32
  }
  func.func @transform_6(%arg0: i32) -> (i32, i32) {
    %c0_i32 = arith.constant 0 : i32
    %c0_i32_0 = arith.constant 0 : i32
    %c0_i32_1 = arith.constant 0 : i32
    return %c0_i32, %c0_i32_0 : i32, i32
  }
  func.func @transform_7(%arg0: i32) -> (i32, i32) {
    %c0_i32 = arith.constant 0 : i32
    %c0_i32_0 = arith.constant 0 : i32
    %c0_i32_1 = arith.constant 0 : i32
    return %c0_i32, %c0_i32_0 : i32, i32
  }
  func.func @transform_8(%arg0: i32) -> (i32, i32) {
    %c0_i32 = arith.constant 0 : i32
    %c0_i32_0 = arith.constant 0 : i32
    %c0_i32_1 = arith.constant 0 : i32
    return %c0_i32, %c0_i32_0 : i32, i32
  }
  func.func @transform_9(%arg0: i32) -> (i32, i32) {
    %c0_i32 = arith.constant 0 : i32
    %c0_i32_0 = arith.constant 0 : i32
    return %arg0, %c0_i32 : i32, i32
  }
}

</mosaic_0001>

<bundles_post_ra>
// kernel: tpu_custom_call.1
= control target key start
LH: loop header
LB: loop body
LE: loop exit
PB: predicated region body
PF: predicated region fallthrough
CT: control target
= control target key end

     0   :  { %14 = vsyncpa [#allocation3], 0  ;;  %s1284_s0 = inlined_call_operand.hbm [shape: f32[2,256], index: 0, kind: input, shape index: {}]   ;;  %s1285_s1 = inlined_call_operand.hbm [shape: bf16[256,128], index: 1, kind: input, shape index: {}]   ;;  %s1286_s2 = inlined_call_operand.vmem [shape: f32[1,128], index: 2, kind: input, shape index: {}]   ;;  %s1287_s3 = inlined_call_operand.hbm [shape: bf16[128,128], index: 3, kind: input, shape index: {}]   ;;  %s1288_s4 = inlined_call_operand.vmem [shape: f32[1,128], index: 4, kind: input, shape index: {}]   ;;  %s1289_s5 = inlined_call_operand.hbm [shape: bf16[128,128], index: 5, kind: input, shape index: {}]   ;;  %s1290_s6 = inlined_call_operand.vmem [shape: f32[1,128], index: 6, kind: input, shape index: {}]   ;;  %s1291_s7 = inlined_call_operand.hbm [shape: bf16[128,256], index: 7, kind: input, shape index: {}]   ;;  %s1292_s8 = inlined_call_operand.vmem [shape: f32[1,256], index: 8, kind: input, shape index: {}]   ;;  %s1293_s9 = inlined_call_operand.hbm [shape: f32[2,256], index: 9, kind: output, shape index: {}]  }
   0x1   :  { %15 = vsyncpa [#allocation6], 0 }
   0x2   :  { %16 = vsyncpa [#allocation9], 0 }
   0x3   :  { %17 = vsyncpa [#allocation4], 0 }
   0x4   :  { %22 = vsyncadd [#allocation3], 192  ;;  %s1080_s30 = smov [#allocation5]   ;;  %s1081_s11 = smov [#allocation8]  }
   0x5   :  { %s35_s10 = sshll.u32 %s1080_s30, 4  ;;  %s63_s12 = sshll.u32 %s1081_s11, 4  ;;  %s36_s10 = int_to_ptr.vmem [resolvable:$true] %s35_s10  ;;  %s1144_s12 = int_to_ptr.vmem [resolvable:$true] %s63_s12 }
   0x6   :  { %s940_s15 = scalar_lea.hbm %s1285_s1, 2048 }
   0x7   :  { %p941_p0 = scmp.ne.s32.totalorder %s1285_s1, %s940_s15  ;;  %p944_p1 = scmp.lt.u32.totalorder %s940_s15, %s1285_s1 }
   0x9   :  { %p946_p2 = pnand %p944_p1, %p941_p0 }
   0xb   :  { %949 = shalt.err (!%p946_p2)
}
   0xc   :  { %s950_s20 = scalar_lea.vmem %s36_s10, 2048  ;;  %p955_p4 = scmp.lt.s32.totalorder %s36_s10, %s36_s10 }
   0xd   :  { %p951_p3 = scmp.ne.s32.totalorder %s36_s10, %s950_s20  ;;  %p956_p5 = scmp.lt.s32.totalorder %s950_s20, %s950_s20 }
   0xf   :  { %p957_p6 = por %p956_p5, %p955_p4 }
  0x11   :  { %p958_p7 = pnand %p957_p6, %p951_p3 }
  0x13   :  { %961 = shalt.err (!%p958_p7)
}
  0x14   :  { %s1082_s21 = smov 64   ;;  %s1083_s22 = smov 4  }
  0x15   :  { %41 = dma.hbm_to_vmem [thread:$0]  %s1285_s1, 2048, %s36_s10, [#allocation6], %s1082_s21, %s1082_s21, %s1083_s22  }
  0x16   :  { %s962_s27 = scalar_lea.hbm %s1289_s5, 1024 }
  0x17   :  { %p963_p8 = scmp.ne.s32.totalorder %s1289_s5, %s962_s27  ;;  %p966_p9 = scmp.lt.u32.totalorder %s962_s27, %s1289_s5 }
  0x19   :  { %p968_p10 = pnand %p966_p9, %p963_p8 }
  0x1b   :  { %971 = shalt.err (!%p968_p10)
}
  0x1c   :  { %s972_s13 = scalar_lea.vmem %s1144_s12, 1024  ;;  %p977_p12 = scmp.lt.s32.totalorder %s1144_s12, %s1144_s12 }
  0x1d   :  { %p973_p11 = scmp.ne.s32.totalorder %s1144_s12, %s972_s13  ;;  %p978_p13 = scmp.lt.s32.totalorder %s972_s13, %s972_s13 }
  0x1f   :  { %p979_p0 = por %p978_p13, %p977_p12 }
  0x21   :  { %p980_p1 = pnand %p979_p0, %p973_p11 }
  0x23   :  { %983 = shalt.err (!%p980_p1)
}
  0x24   :  { %69 = dma.hbm_to_vmem [thread:$0]  %s1289_s5, 1024, %s1144_s12, [#allocation9], %s1082_s21, %s1082_s21, %s1083_s22  }
  0x25   :  { %s1084_s14 = smov [#allocation2]   ;;  %s1085_s16 = smov [#allocation7]  }
  0x26   :  { %s23_s15 = sshll.u32 %s1084_s14, 4  ;;  %s49_s17 = sshll.u32 %s1085_s16, 4  ;;  %s24_s15 = int_to_ptr.vmem [resolvable:$true] %s23_s15  ;;  %s1181_s17 = int_to_ptr.vmem [resolvable:$true] %s49_s17 }
  0x27   :  { %s984_s20 = scalar_lea.hbm %s1284_s0, 64 }
  0x28   :  { %p985_p2 = scmp.ne.s32.totalorder %s1284_s0, %s984_s20  ;;  %p988_p3 = scmp.lt.u32.totalorder %s984_s20, %s1284_s0 }
  0x2a   :  { %p990_p4 = pnand %p988_p3, %p985_p2 }
  0x2c   :  { %993 = shalt.err (!%p990_p4)
}
  0x2d   :  { %s994_s5 = scalar_lea.vmem %s24_s15, 64  ;;  %s998_s12 = scalar_lea.vmem %s24_s15, 256 }
  0x2e   :  { %p995_p5 = scmp.ne.s32.totalorder %s24_s15, %s994_s5  ;;  %p999_p6 = scmp.lt.s32.totalorder %s24_s15, %s24_s15 }
  0x2f   :  { %p1000_p7 = scmp.lt.s32.totalorder %s998_s12, %s994_s5 }
  0x31   :  { %p1001_p8 = por %p1000_p7, %p999_p6 }
  0x33   :  { %p1002_p9 = pnand %p1001_p8, %p995_p5 }
  0x35   :  { %1005 = shalt.err (!%p1002_p9)
}
  0x36   :  { %29 = dma.hbm_to_vmem [thread:$0]  %s1284_s0, 64, %s24_s15, [#allocation3], %s1082_s21, %s1082_s21, %s1083_s22  }
  0x37   :  { %s1006_s11 = scalar_lea.hbm %s1287_s3, 1024 }
  0x38   :  { %p1007_p10 = scmp.ne.s32.totalorder %s1287_s3, %s1006_s11  ;;  %p1010_p11 = scmp.lt.u32.totalorder %s1006_s11, %s1287_s3 }
  0x3a   :  { %p1012_p12 = pnand %p1010_p11, %p1007_p10 }
  0x3c   :  { %1015 = shalt.err (!%p1012_p12)
}
  0x3d   :  { %s1016_s16 = scalar_lea.vmem %s1181_s17, 1024  ;;  %p1021_p0 = scmp.lt.s32.totalorder %s1181_s17, %s1181_s17 }
  0x3e   :  { %p1017_p13 = scmp.ne.s32.totalorder %s1181_s17, %s1016_s16  ;;  %p1022_p1 = scmp.lt.s32.totalorder %s1016_s16, %s1016_s16 }
  0x40   :  { %p1023_p2 = por %p1022_p1, %p1021_p0 }
  0x42   :  { %p1024_p3 = pnand %p1023_p2, %p1017_p13 }
  0x44   :  { %1027 = shalt.err (!%p1024_p3)
}
  0x45   :  { %55 = dma.hbm_to_vmem [thread:$0]  %s1287_s3, 1024, %s1181_s17, [#allocation6], %s1082_s21, %s1082_s21, %s1083_s22  }
  0x46   :  { %s1086_s18 = smov [#allocation10]   ;;  %s1028_s24 = scalar_lea.hbm %s1291_s7, 2048 }
  0x47   :  { %s77_s19 = sshll.u32 %s1086_s18, 4  ;;  %p1029_p4 = scmp.ne.s32.totalorder %s1291_s7, %s1028_s24  ;;  %s78_s19 = int_to_ptr.vmem [resolvable:$true] %s77_s19 }
  0x48   :  { %p1032_p5 = scmp.lt.u32.totalorder %s1028_s24, %s1291_s7 }
  0x4a   :  { %p1034_p6 = pnand %p1032_p5, %p1029_p4 }
  0x4c   :  { %1037 = shalt.err (!%p1034_p6)
}
  0x4d   :  { %s1038_s27 = scalar_lea.vmem %s78_s19, 2048  ;;  %p1043_p8 = scmp.lt.s32.totalorder %s78_s19, %s78_s19 }
  0x4e   :  { %p1039_p7 = scmp.ne.s32.totalorder %s78_s19, %s1038_s27  ;;  %p1044_p9 = scmp.lt.s32.totalorder %s1038_s27, %s1038_s27 }
  0x50   :  { %p1045_p10 = por %p1044_p9, %p1043_p8 }
  0x52   :  { %p1046_p11 = pnand %p1045_p10, %p1039_p7 }
  0x54   :  { %1049 = shalt.err (!%p1046_p11)
}
  0x55   :  { %s1087_s3 = smov 128   ;;  %s1088_s17 = smov 8  }
  0x56   :  { %83 = dma.hbm_to_vmem [thread:$0]  %s1291_s7, 2048, %s78_s19, [#allocation9], %s1087_s3, %s1087_s3, %s1088_s17  }
  0x57   :  { %1072 = dma.done.wait [#allocation3], 256  }
  0x58   :  { %1073 = vsyncadd [#allocation3], 4294967040 }
  0x59   :  { %1074 = dma.done.wait [#allocation6], 3072  }
  0x5a   :  { %1075 = vsyncadd [#allocation6], 4294964224 }
  0x5b   :  { %1076 = dma.done.wait [#allocation9], 3072  }
  0x5c   :  { %1077 = vsyncadd [#allocation9], 4294964224  ;;  %v1089_v0 = vmov 0.0   ;;  %v880_v1 = vld [vmem:[#allocation5 + $0x40] sm:$0xff]   ;;  %v882_v3 = vld [vmem:[#allocation5 + $0x48] sm:$0xff]   ;;  %v115_v9 = vlaneseq  ;;  %vm1091_vm0 = vmmov 0  }
  0x5d   :  { %826 = vmatprep.subr.bf16.mxu1 %v1089_v0  ;;  %v881_v2 = vld [vmem:[#allocation5] sm:$0xff]   ;;  %786 = vmatprep.subr.bf16.mxu0 %v880_v1  ;;  %v883_v4 = vld [vmem:[#allocation5 + $0x8] sm:$0xff]   ;;  %v884_v5 = vld [vmem:[#allocation5 + $0x50] sm:$0xff]   ;;  %v1090_v7 = vmov 1983009808  }
  0x5e   :  { %787 = vmatpush3.bf16.msra.mxu0 %v881_v2  ;;  %v885_v6 = vld [vmem:[#allocation5 + $0x10] sm:$0xff]   ;;  %v113_v8 = vunpack.c.l.s4 %v1090_v7  ;;  %v886_v10 = vld [vmem:[#allocation5 + $0x58] sm:$0xff]   ;;  %v1231_v13 = vshrl.u32 %v115_v9, 7  ;;  %v888_v14 = vld [vmem:[#allocation5 + $0x60] sm:$0xff]   ;;  %842 = vmatprep.mubr.msk.bf16.mxu1 %vm1091_vm0, %v1089_v0 }
  0x5f   :  { %788 = vmatprep.subr.bf16.mxu0 %v882_v3  ;;  %v887_v11 = vld [vmem:[#allocation5 + $0x18] sm:$0xff]   ;;  %v889_v15 = vld [vmem:[#allocation5 + $0x20] sm:$0xff]   ;;  %v890_v16 = vld [vmem:[#allocation5 + $0x68] sm:$0xff]  }
  0x60   :  { %v114_v12 = vunpack.c.0.s8 %v113_v8  ;;  %v891_v18 = vld [vmem:[#allocation5 + $0x28] sm:$0xff]   ;;  %v938_v19 = vld.sshfl [vmem:[#allocation2] sm:$0xff pattern:$0x76325410]  ;;  %v898_v21 = vld [vmem:[#allocation7] sm:$0xff]  }
  0x61   :  { %v939_v20 = vld.sshfl [vmem:[#allocation2 + $0x8] sm:$0xff pattern:$0x76325410]  ;;  %v892_v22 = vld [vmem:[#allocation5 + $0x70] sm:$0xff]   ;;  %827 = vmatpush3.bf16.msra.mxu1 %v898_v21  ;;  %v899_v23 = vld [vmem:[#allocation7 + $0x8] sm:$0xff]  }
  0x62   :  { %789 = vmatpush3.bf16.msra.mxu0 %v883_v4  ;;  %v1234_v17 = vsub.s32 %v114_v12, %v1231_v13  ;;  %v893_v24 = vld [vmem:[#allocation5 + $0x30] sm:$0xff]   ;;  %v127_v25 = vcombine.high %v938_v19, %v939_v20  ;;  %828 = vmatprep.subr.bf16.mxu1 %v1089_v0  ;;  %v894_v26 = vld [vmem:[#allocation5 + $0x78] sm:$0xff]   ;;  %v126_v30 = vcombine.low %v938_v19, %v939_v20  ;;  %v902_v33 = vld [vmem:[#allocation7 + $0x20] sm:$0xff]  }
  0x63   :  { %790 = vmatprep.subr.bf16.mxu0 %v884_v5  ;;  %v900_v28 = vld [vmem:[#allocation7 + $0x10] sm:$0xff]   ;;  %v895_v29 = vld [vmem:[#allocation5 + $0x38] sm:$0xff]   ;;  %v903_v34 = vld [vmem:[#allocation7 + $0x28] sm:$0xff]  }
  0x64   :  { %v131_v27 = vpack.c.bf16 %v127_v25, %v127_v25  ;;  %v901_v31 = vld [vmem:[#allocation7 + $0x18] sm:$0xff]   ;;  %v130_v32 = vpack.c.bf16 %v126_v30, %v126_v30  ;;  %v904_v35 = vld [vmem:[#allocation7 + $0x30] sm:$0xff]   ;;  %v906_v37 = vld [vmem:[#allocation8] sm:$0xff]   ;;  %v555_v25 = vsub.s32 0, %v1231_v13 }
  0x65   :  { %829 = vmatpush3.bf16.msra.mxu1 %v899_v23  ;;  %v905_v36 = vld [vmem:[#allocation7 + $0x38] sm:$0xff]   ;;  %v907_v38 = vld [vmem:[#allocation8 + $0x8] sm:$0xff]   ;;  %v908_v39 = vld [vmem:[#allocation8 + $0x10] sm:$0xff]  }
  0x66   :  { %791 = vmatpush3.bf16.msra.mxu0 %v885_v6  ;;  %299 = vmatprep.mubr.bf16.mxu0 %v131_v27  ;;  %v909_v40 = vld [vmem:[#allocation8 + $0x18] sm:$0xff]   ;;  %v910_v41 = vld [vmem:[#allocation8 + $0x20] sm:$0xff]   ;;  %v911_v42 = vld [vmem:[#allocation8 + $0x28] sm:$0xff]   ;;  %v559_v27 = vsub.s32 1, %v1231_v13 }
  0x67   :  { %792 = vmatprep.subr.bf16.mxu0 %v886_v10  ;;  %830 = vmatprep.subr.bf16.mxu1 %v1089_v0  ;;  %v733_v44 = vld [vmem:[%s1286_s2] ss:$0 sm:$0xff]  ;;  %v913_v53 = vld [vmem:[#allocation8 + $0x38] sm:$0xff]   ;;  %v914_v54 = vld [vmem:[#allocation10] ss:$8 sps:$4 sm:$0xff]  }
  0x68   :  { %v912_v52 = vld [vmem:[#allocation8 + $0x30] sm:$0xff]   ;;  %v916_v55 = vld [vmem:[#allocation10 + $0x4] ss:$8 sps:$4 sm:$0xff]   ;;  %v920_v59 = vld [vmem:[#allocation10 + $0x20] ss:$8 sps:$4 sm:$0xff]  }
  0x69   :  { %831 = vmatpush3.bf16.msra.mxu1 %v900_v28  ;;  %v919_v56 = vld [vmem:[#allocation10 + $0x14] ss:$8 sps:$4 sm:$0xff]   ;;  %v917_v57 = vld [vmem:[#allocation10 + $0x10] ss:$8 sps:$4 sm:$0xff]   ;;  %v922_v58 = vld [vmem:[#allocation10 + $0x24] ss:$8 sps:$4 sm:$0xff]  }
  0x6a   :  { %793 = vmatpush3.bf16.msra.mxu0 %v887_v11  ;;  %832 = vmatprep.subr.bf16.mxu1 %v1089_v0  ;;  %v925_v60 = vld [vmem:[#allocation10 + $0x34] ss:$8 sps:$4 sm:$0xff]   ;;  %v923_v61 = vld [vmem:[#allocation10 + $0x30] ss:$8 sps:$4 sm:$0xff]   ;;  %v928_v62 = vld [vmem:[#allocation10 + $0x44] ss:$8 sps:$4 sm:$0xff]  }
  0x6b   :  { %794 = vmatprep.subr.bf16.mxu0 %v888_v14  ;;  %v926_v63 = vld [vmem:[#allocation10 + $0x40] ss:$8 sps:$4 sm:$0xff]   ;;  %v929_v1 = vld [vmem:[#allocation10 + $0x50] ss:$8 sps:$4 sm:$0xff]   ;;  %v934_v2 = vld [vmem:[#allocation10 + $0x64] ss:$8 sps:$4 sm:$0xff]  }
  0x6c   :  { %v932_v3 = vld [vmem:[#allocation10 + $0x60] ss:$8 sps:$4 sm:$0xff]   ;;  %v750_v4 = vld [vmem:[%s1288_s4] ss:$0 sm:$0xff]  ;;  %v937_v12 = vld [vmem:[#allocation10 + $0x74] ss:$8 sps:$4 sm:$0xff]  }
  0x6d   :  { %833 = vmatpush3.bf16.msra.mxu1 %v901_v31  ;;  %v935_v14 = vld [vmem:[#allocation10 + $0x70] ss:$8 sps:$4 sm:$0xff]  }
  0x6e   :  { %795 = vmatpush3.bf16.msra.mxu0 %v889_v15  ;;  %834 = vmatprep.subr.bf16.mxu1 %v1089_v0  ;;  %v1092_v15 = vmov 0  }
  0x6f   :  { %796 = vmatprep.subr.bf16.mxu0 %v890_v16  ;;  %v759_v16 = vld [vmem:[%s1290_s6] ss:$0 sm:$0xff] }
  0x71   :  { %835 = vmatpush3.bf16.msra.mxu1 %v902_v33 }
  0x72   :  { %797 = vmatpush3.bf16.msra.mxu0 %v891_v18  ;;  %836 = vmatprep.subr.bf16.mxu1 %v1089_v0 }
  0x73   :  { %798 = vmatprep.subr.bf16.mxu0 %v892_v22 }
  0x75   :  { %837 = vmatpush3.bf16.msra.mxu1 %v903_v34 }
  0x76   :  { %799 = vmatpush3.bf16.msra.mxu0 %v893_v24  ;;  %838 = vmatprep.subr.bf16.mxu1 %v1089_v0 }
  0x77   :  { %800 = vmatprep.subr.bf16.mxu0 %v894_v26  ;;  %v551_v26 = vld [vmem:[%s1292_s8] sm:$0x3] }
  0x78   :  { %v556_v28 = vrot.slane %v551_v26, %v555_v25 }
  0x79   :  { %839 = vmatpush3.bf16.msra.mxu1 %v904_v35 }
  0x7a   :  { %801 = vmatpush3.bf16.msra.mxu0 %v895_v29  ;;  %840 = vmatprep.subr.bf16.mxu1 %v1089_v0  ;;  %v560_v29 = vrot.slane %v551_v26, %v559_v27 }
  0x7b   :  { %846 = vmatprep.subr.bf16.mxu0 %v1089_v0 }
  0x7d   :  { %300 = vmatmul.mubr.bf16.vlgmr.msra.gmra.mrb[0].mxu0 %v130_v32  ;;  %841 = vmatpush3.bf16.msra.mxu1 %v905_v36 }
  0x7e   :  { %862 = vmatprep.mubr.msk.bf16.mxu0 %vm1091_vm0, %v1089_v0  ;;  %847 = vmatpush3.bf16.msra.mxu0 %v906_v37 }
  0x7f   :  { %848 = vmatprep.subr.bf16.mxu0 %v1089_v0  ;;  %643 = vmatprep.subr.bf16.mxu1 %v916_v55 }
  0x82   :  { %849 = vmatpush3.bf16.msra.mxu0 %v907_v38 }
  0x83   :  { %850 = vmatprep.subr.bf16.mxu0 %v1089_v0 }
  0x86   :  { %851 = vmatpush3.bf16.msra.mxu0 %v908_v39 }
  0x87   :  { %852 = vmatprep.subr.bf16.mxu0 %v1089_v0 }
  0x8a   :  { %853 = vmatpush3.bf16.msra.mxu0 %v909_v40 }
  0x8b   :  { %854 = vmatprep.subr.bf16.mxu0 %v1089_v0 }
  0x8e   :  { %855 = vmatpush3.bf16.msra.mxu0 %v910_v41 }
  0x8f   :  { %856 = vmatprep.subr.bf16.mxu0 %v1089_v0 }
  0x92   :  { %857 = vmatpush3.bf16.msra.mxu0 %v911_v42 }
  0x93   :  { %858 = vmatprep.subr.bf16.mxu0 %v1089_v0 }
  0x96   :  { %859 = vmatpush3.bf16.msra.mxu0 %v912_v52 }
  0x97   :  { %860 = vmatprep.subr.bf16.mxu0 %v1089_v0  ;;  %v931_v0 = vld [vmem:[#allocation10 + $0x54] ss:$8 sps:$4 sm:$0xff]  }
  0x9a   :  { %861 = vmatpush3.bf16.msra.mxu0 %v913_v53 }
 0x150   :  { %v802_v43 = vpop.f32.mrb[0].mxu0 }
 0x151   :  { %v803_v45 = vpop.f32.mrb[1].mxu0 }
 0x152   :  { %v804_v46 = vadd.f32 %v803_v45, %v802_v43  ;;  %v805_v47 = vpop.f32.mrb[2].mxu0 }
 0x153   :  { %v806_v48 = vpop.f32.mrb[3].mxu0 }
 0x154   :  { %v302_v49 = vadd.f32 %v804_v46, %v733_v44 }
 0x156   :  { %v307_v50 = vmax.f32 %v302_v49, 0.0 }
 0x158   :  { %v308_v51 = vpack.c.bf16 %v307_v50, %v307_v50 }
 0x15a   :  { %843 = vmatmul.mubr.bf16.vlgmr.msra.gmra.mrb[0].mxu1 %v308_v51 }
 0x15b   :  { %644 = vmatpush1.bf16.msra.mxu1 %v914_v54  ;;  %675 = vmatprep.mubr.bf16.mxu1 %v1092_v15 }
 0x15c   :  { %645 = vmatprep.subr.bf16.mxu1 %v919_v56 }
 0x15f   :  { %646 = vmatpush1.bf16.msra.mxu1 %v917_v57 }
 0x160   :  { %647 = vmatprep.subr.bf16.mxu1 %v922_v58 }
 0x163   :  { %648 = vmatpush1.bf16.msra.mxu1 %v920_v59 }
 0x164   :  { %649 = vmatprep.subr.bf16.mxu1 %v925_v60 }
 0x167   :  { %650 = vmatpush1.bf16.msra.mxu1 %v923_v61 }
 0x168   :  { %651 = vmatprep.subr.bf16.mxu1 %v928_v62 }
 0x16b   :  { %652 = vmatpush1.bf16.msra.mxu1 %v926_v63 }
 0x16c   :  { %653 = vmatprep.subr.bf16.mxu1 %v931_v0 }
 0x16f   :  { %654 = vmatpush1.bf16.msra.mxu1 %v929_v1 }
 0x170   :  { %655 = vmatprep.subr.bf16.mxu1 %v934_v2 }
 0x173   :  { %656 = vmatpush1.bf16.msra.mxu1 %v932_v3 }
 0x174   :  { %657 = vmatprep.subr.bf16.mxu1 %v937_v12 }
 0x177   :  { %658 = vmatpush1.bf16.msra.mxu1 %v935_v14 }
 0x22d   :  { %v414_v5 = vpop.f32.mrb[0].mxu1 }
 0x22e   :  { %v415_v6 = vadd.f32 %v750_v4, %v414_v5  ;;  %v844_v7 = vpop.f32.mrb[1].mxu1 }
 0x22f   :  { %v417_v8 = vpop.f32.mrb[2].mxu1 }
 0x230   :  { %v420_v9 = vmax.f32 %v415_v6, 0.0  ;;  %v845_v10 = vpop.f32.mrb[3].mxu1 }
 0x232   :  { %v421_v11 = vpack.c.bf16 %v420_v9, %v420_v9 }
 0x234   :  { %863 = vmatmul.mubr.bf16.vlgmr.msra.gmra.mrb[4].mxu0 %v421_v11 }
 0x307   :  { %v527_v18 = vpop.f32.mrb[4].mxu0 }
 0x308   :  { %v528_v19 = vadd.f32 %v759_v16, %v527_v18  ;;  %v864_v20 = vpop.f32.mrb[5].mxu0 }
 0x309   :  { %v530_v21 = vpop.f32.mrb[6].mxu0 }
 0x30a   :  { %v533_v22 = vmax.f32 %v528_v19, 0.0  ;;  %v865_v23 = vpop.f32.mrb[7].mxu0 }
 0x30c   :  { %v534_v24 = vpack.c.bf16 %v533_v22, %v533_v22 }
 0x30e   :  { %676 = vmatmul.mubr.bf16.vlgmr.msra.gmra.mrb[4].mxu1 %v534_v24 }
 0x3e1   :  { %v677_v30 = vpop.f32.mrb[4].mxu1 }
 0x3e2   :  { %v678_v31 = vadd.f32 %v677_v30, %v556_v28  ;;  %v679_v32 = vpop.f32.mrb[5].mxu1 }
 0x3e3   :  { %v680_v33 = vadd.f32 %v679_v32, %v560_v29  ;;  %v681_v34 = vpop.f32.mrb[6].mxu1 }
 0x3e4   :  { %v684_v35 = vmax.f32 %v678_v31, 0.0  ;;  %v682_v36 = vpop.f32.mrb[7].mxu1 }
 0x3e5   :  { %v685_v37 = vmax.f32 %v680_v33, 0.0 }
 0x3e7   :  { %v688_v38 = vcombine.low %v684_v35, %v685_v37  ;;  %v689_v39 = vcombine.high %v684_v35, %v685_v37 }
 0x3e9   :  { %v696_v40 = vrot.slane %v688_v38, %v1234_v17  ;;  %v703_v41 = vrot.slane %v689_v39, %v1234_v17  ;;  %784 = vst.sshfl [vmem:[#allocation11] sm:$0x33 pattern:$0x76325410] %v688_v38 }
 0x3ea   :  { %785 = vst.sshfl [vmem:[#allocation11 + $0x8] sm:$0x33 pattern:$0x76325410] %v689_v39 }
 0x3eb   :  { %v704_v42 = vcombine.high %v696_v40, %v696_v40  ;;  %v705_v13 = vcombine.high %v703_v41, %v703_v41 }
 0x3ed   :  { %711 = vst [vmem:[#allocation11 + $0x4] sm:$0xf] %v704_v42  ;;  %713 = vst [vmem:[#allocation11 + $0xc] sm:$0xf] %v705_v13 }
 0x3ee   :  { %718 = vsyncadd [#allocation4], 192  ;;  %s1093_s6 = smov [#allocation11]  }
 0x3ef   :  { %s719_s8 = sshll.u32 %s1093_s6, 4  ;;  %s720_s8 = int_to_ptr.vmem [resolvable:$true] %s719_s8 }
 0x3f0   :  { %s1050_s14 = scalar_lea.vmem %s720_s8, 64  ;;  %s1054_s16 = scalar_lea.vmem %s720_s8, 256 }
 0x3f1   :  { %p1051_p12 = scmp.ne.s32.totalorder %s720_s8, %s1050_s14  ;;  %p1055_p13 = scmp.lt.s32.totalorder %s720_s8, %s720_s8 }
 0x3f2   :  { %p1056_p0 = scmp.lt.s32.totalorder %s1054_s16, %s1050_s14 }
 0x3f4   :  { %p1057_p1 = por %p1056_p0, %p1055_p13 }
 0x3f6   :  { %p1058_p2 = pnand %p1057_p1, %p1051_p12 }
 0x3f8   :  { %1061 = shalt.err (!%p1058_p2)
}
 0x3f9   :  { %s1062_s18 = scalar_lea.hbm %s1293_s9, 64 }
 0x3fa   :  { %p1063_p3 = scmp.ne.s32.totalorder %s1293_s9, %s1062_s18  ;;  %p1066_p4 = scmp.lt.u32.totalorder %s1062_s18, %s1293_s9 }
 0x3fc   :  { %p1068_p5 = pnand %p1066_p4, %p1063_p3 }
 0x3fe   :  { %1071 = shalt.err (!%p1068_p5)
}
 0x3ff   :  { %725 = dma.vmem_to_hbm [thread:$0]  %s720_s8, 64, %s1293_s9, [#allocation4], %s1082_s21, %s1082_s21, %s1083_s22  }
 0x400   :  { %1078 = dma.done.wait [#allocation4], 256  }
 0x401   :  { %1079 = vsyncadd [#allocation4], 4294967040 }
 0x402   :  { %729 = vsyncpa [#allocation3], 1 }
 0x403   :  { %730 = vsyncpa [#allocation6], 1 }
 0x404   :  { %731 = vsyncpa [#allocation9], 1 }
 0x405   :  { %732 = vsyncpa [#allocation4], 1 }

// kernel: tpu_custom_call.1
= control target key start
LH: loop header
LB: loop body
LE: loop exit
PB: predicated region body
PF: predicated region fallthrough
CT: control target
= control target key end

     0   :  { %14 = vsyncpa [#allocation3], 0  ;;  %s1284_s0 = inlined_call_operand.hbm [shape: f32[2,256], index: 0, kind: input, shape index: {}]   ;;  %s1285_s1 = inlined_call_operand.hbm [shape: bf16[256,128], index: 1, kind: input, shape index: {}]   ;;  %s1286_s2 = inlined_call_operand.vmem [shape: f32[1,128], index: 2, kind: input, shape index: {}]   ;;  %s1287_s3 = inlined_call_operand.hbm [shape: bf16[128,128], index: 3, kind: input, shape index: {}]   ;;  %s1288_s4 = inlined_call_operand.vmem [shape: f32[1,128], index: 4, kind: input, shape index: {}]   ;;  %s1289_s5 = inlined_call_operand.hbm [shape: bf16[128,128], index: 5, kind: input, shape index: {}]   ;;  %s1290_s6 = inlined_call_operand.vmem [shape: f32[1,128], index: 6, kind: input, shape index: {}]   ;;  %s1291_s7 = inlined_call_operand.hbm [shape: bf16[128,256], index: 7, kind: input, shape index: {}]   ;;  %s1292_s8 = inlined_call_operand.vmem [shape: f32[1,256], index: 8, kind: input, shape index: {}]   ;;  %s1293_s9 = inlined_call_operand.hbm [shape: f32[2,256], index: 9, kind: output, shape index: {}]  }
   0x1   :  { %15 = vsyncpa [#allocation6], 0 }
   0x2   :  { %16 = vsyncpa [#allocation9], 0 }
   0x3   :  { %17 = vsyncpa [#allocation4], 0 }
   0x4   :  { %22 = vsyncadd [#allocation3], 192  ;;  %s1080_s30 = smov [#allocation5]   ;;  %s1081_s11 = smov [#allocation8]  }
   0x5   :  { %s35_s10 = sshll.u32 %s1080_s30, 4  ;;  %s63_s12 = sshll.u32 %s1081_s11, 4  ;;  %s36_s10 = int_to_ptr.vmem [resolvable:$true] %s35_s10  ;;  %s1144_s12 = int_to_ptr.vmem [resolvable:$true] %s63_s12 }
   0x6   :  { %s940_s15 = scalar_lea.hbm %s1285_s1, 2048 }
   0x7   :  { %p941_p0 = scmp.ne.s32.totalorder %s1285_s1, %s940_s15  ;;  %p944_p1 = scmp.lt.u32.totalorder %s940_s15, %s1285_s1 }
   0x9   :  { %p946_p2 = pnand %p944_p1, %p941_p0 }
   0xb   :  { %949 = shalt.err (!%p946_p2)
}
   0xc   :  { %s950_s20 = scalar_lea.vmem %s36_s10, 2048  ;;  %p955_p4 = scmp.lt.s32.totalorder %s36_s10, %s36_s10 }
   0xd   :  { %p951_p3 = scmp.ne.s32.totalorder %s36_s10, %s950_s20  ;;  %p956_p5 = scmp.lt.s32.totalorder %s950_s20, %s950_s20 }
   0xf   :  { %p957_p6 = por %p956_p5, %p955_p4 }
  0x11   :  { %p958_p7 = pnand %p957_p6, %p951_p3 }
  0x13   :  { %961 = shalt.err (!%p958_p7)
}
  0x14   :  { %s1082_s21 = smov 64   ;;  %s1083_s22 = smov 4  }
  0x15   :  { %41 = dma.hbm_to_vmem [thread:$0]  %s1285_s1, 2048, %s36_s10, [#allocation6], %s1082_s21, %s1082_s21, %s1083_s22  }
  0x16   :  { %s962_s27 = scalar_lea.hbm %s1289_s5, 1024 }
  0x17   :  { %p963_p8 = scmp.ne.s32.totalorder %s1289_s5, %s962_s27  ;;  %p966_p9 = scmp.lt.u32.totalorder %s962_s27, %s1289_s5 }
  0x19   :  { %p968_p10 = pnand %p966_p9, %p963_p8 }
  0x1b   :  { %971 = shalt.err (!%p968_p10)
}
  0x1c   :  { %s972_s13 = scalar_lea.vmem %s1144_s12, 1024  ;;  %p977_p12 = scmp.lt.s32.totalorder %s1144_s12, %s1144_s12 }
  0x1d   :  { %p973_p11 = scmp.ne.s32.totalorder %s1144_s12, %s972_s13  ;;  %p978_p13 = scmp.lt.s32.totalorder %s972_s13, %s972_s13 }
  0x1f   :  { %p979_p0 = por %p978_p13, %p977_p12 }
  0x21   :  { %p980_p1 = pnand %p979_p0, %p973_p11 }
  0x23   :  { %983 = shalt.err (!%p980_p1)
}
  0x24   :  { %69 = dma.hbm_to_vmem [thread:$0]  %s1289_s5, 1024, %s1144_s12, [#allocation9], %s1082_s21, %s1082_s21, %s1083_s22  }
  0x25   :  { %s1084_s14 = smov [#allocation2]   ;;  %s1085_s16 = smov [#allocation7]  }
  0x26   :  { %s23_s15 = sshll.u32 %s1084_s14, 4  ;;  %s49_s17 = sshll.u32 %s1085_s16, 4  ;;  %s24_s15 = int_to_ptr.vmem [resolvable:$true] %s23_s15  ;;  %s1181_s17 = int_to_ptr.vmem [resolvable:$true] %s49_s17 }
  0x27   :  { %s984_s20 = scalar_lea.hbm %s1284_s0, 64 }
  0x28   :  { %p985_p2 = scmp.ne.s32.totalorder %s1284_s0, %s984_s20  ;;  %p988_p3 = scmp.lt.u32.totalorder %s984_s20, %s1284_s0 }
  0x2a   :  { %p990_p4 = pnand %p988_p3, %p985_p2 }
  0x2c   :  { %993 = shalt.err (!%p990_p4)
}
  0x2d   :  { %s994_s5 = scalar_lea.vmem %s24_s15, 64  ;;  %s998_s12 = scalar_lea.vmem %s24_s15, 256 }
  0x2e   :  { %p995_p5 = scmp.ne.s32.totalorder %s24_s15, %s994_s5  ;;  %p999_p6 = scmp.lt.s32.totalorder %s24_s15, %s24_s15 }
  0x2f   :  { %p1000_p7 = scmp.lt.s32.totalorder %s998_s12, %s994_s5 }
  0x31   :  { %p1001_p8 = por %p1000_p7, %p999_p6 }
  0x33   :  { %p1002_p9 = pnand %p1001_p8, %p995_p5 }
  0x35   :  { %1005 = shalt.err (!%p1002_p9)
}
  0x36   :  { %29 = dma.hbm_to_vmem [thread:$0]  %s1284_s0, 64, %s24_s15, [#allocation3], %s1082_s21, %s1082_s21, %s1083_s22  }
  0x37   :  { %s1006_s11 = scalar_lea.hbm %s1287_s3, 1024 }
  0x38   :  { %p1007_p10 = scmp.ne.s32.totalorder %s1287_s3, %s1006_s11  ;;  %p1010_p11 = scmp.lt.u32.totalorder %s1006_s11, %s1287_s3 }
  0x3a   :  { %p1012_p12 = pnand %p1010_p11, %p1007_p10 }
  0x3c   :  { %1015 = shalt.err (!%p1012_p12)
}
  0x3d   :  { %s1016_s16 = scalar_lea.vmem %s1181_s17, 1024  ;;  %p1021_p0 = scmp.lt.s32.totalorder %s1181_s17, %s1181_s17 }
  0x3e   :  { %p1017_p13 = scmp.ne.s32.totalorder %s1181_s17, %s1016_s16  ;;  %p1022_p1 = scmp.lt.s32.totalorder %s1016_s16, %s1016_s16 }
  0x40   :  { %p1023_p2 = por %p1022_p1, %p1021_p0 }
  0x42   :  { %p1024_p3 = pnand %p1023_p2, %p1017_p13 }
  0x44   :  { %1027 = shalt.err (!%p1024_p3)
}
  0x45   :  { %55 = dma.hbm_to_vmem [thread:$0]  %s1287_s3, 1024, %s1181_s17, [#allocation6], %s1082_s21, %s1082_s21, %s1083_s22  }
  0x46   :  { %s1086_s18 = smov [#allocation10]   ;;  %s1028_s24 = scalar_lea.hbm %s1291_s7, 2048 }
  0x47   :  { %s77_s19 = sshll.u32 %s1086_s18, 4  ;;  %p1029_p4 = scmp.ne.s32.totalorder %s1291_s7, %s1028_s24  ;;  %s78_s19 = int_to_ptr.vmem [resolvable:$true] %s77_s19 }
  0x48   :  { %p1032_p5 = scmp.lt.u32.totalorder %s1028_s24, %s1291_s7 }
  0x4a   :  { %p1034_p6 = pnand %p1032_p5, %p1029_p4 }
  0x4c   :  { %1037 = shalt.err (!%p1034_p6)
}
  0x4d   :  { %s1038_s27 = scalar_lea.vmem %s78_s19, 2048  ;;  %p1043_p8 = scmp.lt.s32.totalorder %s78_s19, %s78_s19 }
  0x4e   :  { %p1039_p7 = scmp.ne.s32.totalorder %s78_s19, %s1038_s27  ;;  %p1044_p9 = scmp.lt.s32.totalorder %s1038_s27, %s1038_s27 }
  0x50   :  { %p1045_p10 = por %p1044_p9, %p1043_p8 }
  0x52   :  { %p1046_p11 = pnand %p1045_p10, %p1039_p7 }
  0x54   :  { %1049 = shalt.err (!%p1046_p11)
}
  0x55   :  { %s1087_s3 = smov 128   ;;  %s1088_s17 = smov 8  }
  0x56   :  { %83 = dma.hbm_to_vmem [thread:$0]  %s1291_s7, 2048, %s78_s19, [#allocation9], %s1087_s3, %s1087_s3, %s1088_s17  }
  0x57   :  { %1072 = dma.done.wait [#allocation3], 256  }
  0x58   :  { %1073 = vsyncadd [#allocation3], 4294967040 }
  0x59   :  { %1074 = dma.done.wait [#allocation6], 3072  }
  0x5a   :  { %1075 = vsyncadd [#allocation6], 4294964224 }
  0x5b   :  { %1076 = dma.done.wait [#allocation9], 3072  }
  0x5c   :  { %1077 = vsyncadd [#allocation9], 4294964224  ;;  %v1089_v0 = vmov 0.0   ;;  %v880_v1 = vld [vmem:[#allocation5 + $0x40] sm:$0xff]   ;;  %v882_v3 = vld [vmem:[#allocation5 + $0x48] sm:$0xff]   ;;  %v115_v9 = vlaneseq  ;;  %vm1091_vm0 = vmmov 0  }
  0x5d   :  { %826 = vmatprep.subr.bf16.mxu1 %v1089_v0  ;;  %v881_v2 = vld [vmem:[#allocation5] sm:$0xff]   ;;  %786 = vmatprep.subr.bf16.mxu0 %v880_v1  ;;  %v883_v4 = vld [vmem:[#allocation5 + $0x8] sm:$0xff]   ;;  %v884_v5 = vld [vmem:[#allocation5 + $0x50] sm:$0xff]   ;;  %v1090_v7 = vmov 1983009808  }
  0x5e   :  { %787 = vmatpush3.bf16.msra.mxu0 %v881_v2  ;;  %v885_v6 = vld [vmem:[#allocation5 + $0x10] sm:$0xff]   ;;  %v113_v8 = vunpack.c.l.s4 %v1090_v7  ;;  %v886_v10 = vld [vmem:[#allocation5 + $0x58] sm:$0xff]   ;;  %v1231_v13 = vshrl.u32 %v115_v9, 7  ;;  %v888_v14 = vld [vmem:[#allocation5 + $0x60] sm:$0xff]   ;;  %842 = vmatprep.mubr.msk.bf16.mxu1 %vm1091_vm0, %v1089_v0 }
  0x5f   :  { %788 = vmatprep.subr.bf16.mxu0 %v882_v3  ;;  %v887_v11 = vld [vmem:[#allocation5 + $0x18] sm:$0xff]   ;;  %v889_v15 = vld [vmem:[#allocation5 + $0x20] sm:$0xff]   ;;  %v890_v16 = vld [vmem:[#allocation5 + $0x68] sm:$0xff]  }
  0x60   :  { %v114_v12 = vunpack.c.0.s8 %v113_v8  ;;  %v891_v18 = vld [vmem:[#allocation5 + $0x28] sm:$0xff]   ;;  %v938_v19 = vld.sshfl [vmem:[#allocation2] sm:$0xff pattern:$0x76325410]  ;;  %v898_v21 = vld [vmem:[#allocation7] sm:$0xff]  }
  0x61   :  { %v939_v20 = vld.sshfl [vmem:[#allocation2 + $0x8] sm:$0xff pattern:$0x76325410]  ;;  %v892_v22 = vld [vmem:[#allocation5 + $0x70] sm:$0xff]   ;;  %827 = vmatpush3.bf16.msra.mxu1 %v898_v21  ;;  %v899_v23 = vld [vmem:[#allocation7 + $0x8] sm:$0xff]  }
  0x62   :  { %789 = vmatpush3.bf16.msra.mxu0 %v883_v4  ;;  %v1234_v17 = vsub.s32 %v114_v12, %v1231_v13  ;;  %v893_v24 = vld [vmem:[#allocation5 + $0x30] sm:$0xff]   ;;  %v127_v25 = vcombine.high %v938_v19, %v939_v20  ;;  %828 = vmatprep.subr.bf16.mxu1 %v1089_v0  ;;  %v894_v26 = vld [vmem:[#allocation5 + $0x78] sm:$0xff]   ;;  %v126_v30 = vcombine.low %v938_v19, %v939_v20  ;;  %v902_v33 = vld [vmem:[#allocation7 + $0x20] sm:$0xff]  }
  0x63   :  { %790 = vmatprep.subr.bf16.mxu0 %v884_v5  ;;  %v900_v28 = vld [vmem:[#allocation7 + $0x10] sm:$0xff]   ;;  %v895_v29 = vld [vmem:[#allocation5 + $0x38] sm:$0xff]   ;;  %v903_v34 = vld [vmem:[#allocation7 + $0x28] sm:$0xff]  }
  0x64   :  { %v131_v27 = vpack.c.bf16 %v127_v25, %v127_v25  ;;  %v901_v31 = vld [vmem:[#allocation7 + $0x18] sm:$0xff]   ;;  %v130_v32 = vpack.c.bf16 %v126_v30, %v126_v30  ;;  %v904_v35 = vld [vmem:[#allocation7 + $0x30] sm:$0xff]   ;;  %v906_v37 = vld [vmem:[#allocation8] sm:$0xff]   ;;  %v555_v25 = vsub.s32 0, %v1231_v13 }
  0x65   :  { %829 = vmatpush3.bf16.msra.mxu1 %v899_v23  ;;  %v905_v36 = vld [vmem:[#allocation7 + $0x38] sm:$0xff]   ;;  %v907_v38 = vld [vmem:[#allocation8 + $0x8] sm:$0xff]   ;;  %v908_v39 = vld [vmem:[#allocation8 + $0x10] sm:$0xff]  }
  0x66   :  { %791 = vmatpush3.bf16.msra.mxu0 %v885_v6  ;;  %299 = vmatprep.mubr.bf16.mxu0 %v131_v27  ;;  %v909_v40 = vld [vmem:[#allocation8 + $0x18] sm:$0xff]   ;;  %v910_v41 = vld [vmem:[#allocation8 + $0x20] sm:$0xff]   ;;  %v911_v42 = vld [vmem:[#allocation8 + $0x28] sm:$0xff]   ;;  %v559_v27 = vsub.s32 1, %v1231_v13 }
  0x67   :  { %792 = vmatprep.subr.bf16.mxu0 %v886_v10  ;;  %830 = vmatprep.subr.bf16.mxu1 %v1089_v0  ;;  %v733_v44 = vld [vmem:[%s1286_s2] ss:$0 sm:$0xff]  ;;  %v913_v53 = vld [vmem:[#allocation8 + $0x38] sm:$0xff]   ;;  %v914_v54 = vld [vmem:[#allocation10] ss:$8 sps:$4 sm:$0xff]  }
  0x68   :  { %v912_v52 = vld [vmem:[#allocation8 + $0x30] sm:$0xff]   ;;  %v916_v55 = vld [vmem:[#allocation10 + $0x4] ss:$8 sps:$4 sm:$0xff]   ;;  %v920_v59 = vld [vmem:[#allocation10 + $0x20] ss:$8 sps:$4 sm:$0xff]  }
  0x69   :  { %831 = vmatpush3.bf16.msra.mxu1 %v900_v28  ;;  %v919_v56 = vld [vmem:[#allocation10 + $0x14] ss:$8 sps:$4 sm:$0xff]   ;;  %v917_v57 = vld [vmem:[#allocation10 + $0x10] ss:$8 sps:$4 sm:$0xff]   ;;  %v922_v58 = vld [vmem:[#allocation10 + $0x24] ss:$8 sps:$4 sm:$0xff]  }
  0x6a   :  { %793 = vmatpush3.bf16.msra.mxu0 %v887_v11  ;;  %832 = vmatprep.subr.bf16.mxu1 %v1089_v0  ;;  %v925_v60 = vld [vmem:[#allocation10 + $0x34] ss:$8 sps:$4 sm:$0xff]   ;;  %v923_v61 = vld [vmem:[#allocation10 + $0x30] ss:$8 sps:$4 sm:$0xff]   ;;  %v928_v62 = vld [vmem:[#allocation10 + $0x44] ss:$8 sps:$4 sm:$0xff]  }
  0x6b   :  { %794 = vmatprep.subr.bf16.mxu0 %v888_v14  ;;  %v926_v63 = vld [vmem:[#allocation10 + $0x40] ss:$8 sps:$4 sm:$0xff]   ;;  %v929_v1 = vld [vmem:[#allocation10 + $0x50] ss:$8 sps:$4 sm:$0xff]   ;;  %v934_v2 = vld [vmem:[#allocation10 + $0x64] ss:$8 sps:$4 sm:$0xff]  }
  0x6c   :  { %v932_v3 = vld [vmem:[#allocation10 + $0x60] ss:$8 sps:$4 sm:$0xff]   ;;  %v750_v4 = vld [vmem:[%s1288_s4] ss:$0 sm:$0xff]  ;;  %v937_v12 = vld [vmem:[#allocation10 + $0x74] ss:$8 sps:$4 sm:$0xff]  }
  0x6d   :  { %833 = vmatpush3.bf16.msra.mxu1 %v901_v31  ;;  %v935_v14 = vld [vmem:[#allocation10 + $0x70] ss:$8 sps:$4 sm:$0xff]  }
  0x6e   :  { %795 = vmatpush3.bf16.msra.mxu0 %v889_v15  ;;  %834 = vmatprep.subr.bf16.mxu1 %v1089_v0  ;;  %v1092_v15 = vmov 0  }
  0x6f   :  { %796 = vmatprep.subr.bf16.mxu0 %v890_v16  ;;  %v759_v16 = vld [vmem:[%s1290_s6] ss:$0 sm:$0xff] }
  0x71   :  { %835 = vmatpush3.bf16.msra.mxu1 %v902_v33 }
  0x72   :  { %797 = vmatpush3.bf16.msra.mxu0 %v891_v18  ;;  %836 = vmatprep.subr.bf16.mxu1 %v1089_v0 }
  0x73   :  { %798 = vmatprep.subr.bf16.mxu0 %v892_v22 }
  0x75   :  { %837 = vmatpush3.bf16.msra.mxu1 %v903_v34 }
  0x76   :  { %799 = vmatpush3.bf16.msra.mxu0 %v893_v24  ;;  %838 = vmatprep.subr.bf16.mxu1 %v1089_v0 }
  0x77   :  { %800 = vmatprep.subr.bf16.mxu0 %v894_v26  ;;  %v551_v26 = vld [vmem:[%s1292_s8] sm:$0x3] }
  0x78   :  { %v556_v28 = vrot.slane %v551_v26, %v555_v25 }
  0x79   :  { %839 = vmatpush3.bf16.msra.mxu1 %v904_v35 }
  0x7a   :  { %801 = vmatpush3.bf16.msra.mxu0 %v895_v29  ;;  %840 = vmatprep.subr.bf16.mxu1 %v1089_v0  ;;  %v560_v29 = vrot.slane %v551_v26, %v559_v27 }
  0x7b   :  { %846 = vmatprep.subr.bf16.mxu0 %v1089_v0 }
  0x7d   :  { %300 = vmatmul.mubr.bf16.vlgmr.msra.gmra.mrb[0].mxu0 %v130_v32  ;;  %841 = vmatpush3.bf16.msra.mxu1 %v905_v36 }
  0x7e   :  { %862 = vmatprep.mubr.msk.bf16.mxu0 %vm1091_vm0, %v1089_v0  ;;  %847 = vmatpush3.bf16.msra.mxu0 %v906_v37 }
  0x7f   :  { %848 = vmatprep.subr.bf16.mxu0 %v1089_v0  ;;  %643 = vmatprep.subr.bf16.mxu1 %v916_v55 }
  0x82   :  { %849 = vmatpush3.bf16.msra.mxu0 %v907_v38 }
  0x83   :  { %850 = vmatprep.subr.bf16.mxu0 %v1089_v0 }
  0x86   :  { %851 = vmatpush3.bf16.msra.mxu0 %v908_v39 }
  0x87   :  { %852 = vmatprep.subr.bf16.mxu0 %v1089_v0 }
  0x8a   :  { %853 = vmatpush3.bf16.msra.mxu0 %v909_v40 }
  0x8b   :  { %854 = vmatprep.subr.bf16.mxu0 %v1089_v0 }
  0x8e   :  { %855 = vmatpush3.bf16.msra.mxu0 %v910_v41 }
  0x8f   :  { %856 = vmatprep.subr.bf16.mxu0 %v1089_v0 }
  0x92   :  { %857 = vmatpush3.bf16.msra.mxu0 %v911_v42 }
  0x93   :  { %858 = vmatprep.subr.bf16.mxu0 %v1089_v0 }
  0x96   :  { %859 = vmatpush3.bf16.msra.mxu0 %v912_v52 }
  0x97   :  { %860 = vmatprep.subr.bf16.mxu0 %v1089_v0  ;;  %v931_v0 = vld [vmem:[#allocation10 + $0x54] ss:$8 sps:$4 sm:$0xff]  }
  0x9a   :  { %861 = vmatpush3.bf16.msra.mxu0 %v913_v53 }
 0x150   :  { %v802_v43 = vpop.f32.mrb[0].mxu0 }
 0x151   :  { %v803_v45 = vpop.f32.mrb[1].mxu0 }
 0x152   :  { %v804_v46 = vadd.f32 %v803_v45, %v802_v43  ;;  %v805_v47 = vpop.f32.mrb[2].mxu0 }
 0x153   :  { %v806_v48 = vpop.f32.mrb[3].mxu0 }
 0x154   :  { %v302_v49 = vadd.f32 %v804_v46, %v733_v44 }
 0x156   :  { %v307_v50 = vmax.f32 %v302_v49, 0.0 }
 0x158   :  { %v308_v51 = vpack.c.bf16 %v307_v50, %v307_v50 }
 0x15a   :  { %843 = vmatmul.mubr.bf16.vlgmr.msra.gmra.mrb[0].mxu1 %v308_v51 }
 0x15b   :  { %644 = vmatpush1.bf16.msra.mxu1 %v914_v54  ;;  %675 = vmatprep.mubr.bf16.mxu1 %v1092_v15 }
 0x15c   :  { %645 = vmatprep.subr.bf16.mxu1 %v919_v56 }
 0x15f   :  { %646 = vmatpush1.bf16.msra.mxu1 %v917_v57 }
 0x160   :  { %647 = vmatprep.subr.bf16.mxu1 %v922_v58 }
 0x163   :  { %648 = vmatpush1.bf16.msra.mxu1 %v920_v59 }
 0x164   :  { %649 = vmatprep.subr.bf16.mxu1 %v925_v60 }
 0x167   :  { %650 = vmatpush1.bf16.msra.mxu1 %v923_v61 }
 0x168   :  { %651 = vmatprep.subr.bf16.mxu1 %v928_v62 }
 0x16b   :  { %652 = vmatpush1.bf16.msra.mxu1 %v926_v63 }
 0x16c   :  { %653 = vmatprep.subr.bf16.mxu1 %v931_v0 }
 0x16f   :  { %654 = vmatpush1.bf16.msra.mxu1 %v929_v1 }
 0x170   :  { %655 = vmatprep.subr.bf16.mxu1 %v934_v2 }
 0x173   :  { %656 = vmatpush1.bf16.msra.mxu1 %v932_v3 }
 0x174   :  { %657 = vmatprep.subr.bf16.mxu1 %v937_v12 }
 0x177   :  { %658 = vmatpush1.bf16.msra.mxu1 %v935_v14 }
 0x22d   :  { %v414_v5 = vpop.f32.mrb[0].mxu1 }
 0x22e   :  { %v415_v6 = vadd.f32 %v750_v4, %v414_v5  ;;  %v844_v7 = vpop.f32.mrb[1].mxu1 }
 0x22f   :  { %v417_v8 = vpop.f32.mrb[2].mxu1 }
 0x230   :  { %v420_v9 = vmax.f32 %v415_v6, 0.0  ;;  %v845_v10 = vpop.f32.mrb[3].mxu1 }
 0x232   :  { %v421_v11 = vpack.c.bf16 %v420_v9, %v420_v9 }
 0x234   :  { %863 = vmatmul.mubr.bf16.vlgmr.msra.gmra.mrb[4].mxu0 %v421_v11 }
 0x307   :  { %v527_v18 = vpop.f32.mrb[4].mxu0 }
 0x308   :  { %v528_v19 = vadd.f32 %v759_v16, %v527_v18  ;;  %v864_v20 = vpop.f32.mrb[5].mxu0 }
 0x309   :  { %v530_v21 = vpop.f32.mrb[6].mxu0 }
 0x30a   :  { %v533_v22 = vmax.f32 %v528_v19, 0.0  ;;  %v865_v23 = vpop.f32.mrb[7].mxu0 }
 0x30c   :  { %v534_v24 = vpack.c.bf16 %v533_v22, %v533_v22 }
 0x30e   :  { %676 = vmatmul.mubr.bf16.vlgmr.msra.gmra.mrb[4].mxu1 %v534_v24 }
 0x3e1   :  { %v677_v30 = vpop.f32.mrb[4].mxu1 }
 0x3e2   :  { %v678_v31 = vadd.f32 %v677_v30, %v556_v28  ;;  %v679_v32 = vpop.f32.mrb[5].mxu1 }
 0x3e3   :  { %v680_v33 = vadd.f32 %v679_v32, %v560_v29  ;;  %v681_v34 = vpop.f32.mrb[6].mxu1 }
 0x3e4   :  { %v684_v35 = vmax.f32 %v678_v31, 0.0  ;;  %v682_v36 = vpop.f32.mrb[7].mxu1 }
 0x3e5   :  { %v685_v37 = vmax.f32 %v680_v33, 0.0 }
 0x3e7   :  { %v688_v38 = vcombine.low %v684_v35, %v685_v37  ;;  %v689_v39 = vcombine.high %v684_v35, %v685_v37 }
 0x3e9   :  { %v696_v40 = vrot.slane %v688_v38, %v1234_v17  ;;  %v703_v41 = vrot.slane %v689_v39, %v1234_v17  ;;  %784 = vst.sshfl [vmem:[#allocation11] sm:$0x33 pattern:$0x76325410] %v688_v38 }
 0x3ea   :  { %785 = vst.sshfl [vmem:[#allocation11 + $0x8] sm:$0x33 pattern:$0x76325410] %v689_v39 }
 0x3eb   :  { %v704_v42 = vcombine.high %v696_v40, %v696_v40  ;;  %v705_v13 = vcombine.high %v703_v41, %v703_v41 }
 0x3ed   :  { %711 = vst [vmem:[#allocation11 + $0x4] sm:$0xf] %v704_v42  ;;  %713 = vst [vmem:[#allocation11 + $0xc] sm:$0xf] %v705_v13 }
 0x3ee   :  { %718 = vsyncadd [#allocation4], 192  ;;  %s1093_s6 = smov [#allocation11]  }
 0x3ef   :  { %s719_s8 = sshll.u32 %s1093_s6, 4  ;;  %s720_s8 = int_to_ptr.vmem [resolvable:$true] %s719_s8 }
 0x3f0   :  { %s1050_s14 = scalar_lea.vmem %s720_s8, 64  ;;  %s1054_s16 = scalar_lea.vmem %s720_s8, 256 }
 0x3f1   :  { %p1051_p12 = scmp.ne.s32.totalorder %s720_s8, %s1050_s14  ;;  %p1055_p13 = scmp.lt.s32.totalorder %s720_s8, %s720_s8 }
 0x3f2   :  { %p1056_p0 = scmp.lt.s32.totalorder %s1054_s16, %s1050_s14 }
 0x3f4   :  { %p1057_p1 = por %p1056_p0, %p1055_p13 }
 0x3f6   :  { %p1058_p2 = pnand %p1057_p1, %p1051_p12 }
 0x3f8   :  { %1061 = shalt.err (!%p1058_p2)
}
 0x3f9   :  { %s1062_s18 = scalar_lea.hbm %s1293_s9, 64 }
 0x3fa   :  { %p1063_p3 = scmp.ne.s32.totalorder %s1293_s9, %s1062_s18  ;;  %p1066_p4 = scmp.lt.u32.totalorder %s1062_s18, %s1293_s9 }
 0x3fc   :  { %p1068_p5 = pnand %p1066_p4, %p1063_p3 }
 0x3fe   :  { %1071 = shalt.err (!%p1068_p5)
}
 0x3ff   :  { %725 = dma.vmem_to_hbm [thread:$0]  %s720_s8, 64, %s1293_s9, [#allocation4], %s1082_s21, %s1082_s21, %s1083_s22  }
 0x400   :  { %1078 = dma.done.wait [#allocation4], 256  }
 0x401   :  { %1079 = vsyncadd [#allocation4], 4294967040 }
 0x402   :  { %729 = vsyncpa [#allocation3], 1 }
 0x403   :  { %730 = vsyncpa [#allocation6], 1 }
 0x404   :  { %731 = vsyncpa [#allocation9], 1 }
 0x405   :  { %732 = vsyncpa [#allocation4], 1 }

</bundles_post_ra>
